<compile_context>
chip_gen: v7x
topology: tpu7x:2x2x1
jax: 0.10.0
libtpu: 0.0.40
codegen_flags: <defaults>
</compile_context>

<pallas_src>
import functools

import jax
import jax.numpy as jnp
from jax.experimental import pallas as pl
from jax.experimental.pallas import tpu as pltpu

_TARGET_TILE_BYTES = 4 * 1024 * 1024      # per-array tile (x / out)
_VMEM_LIMIT_BYTES = 48 * 1024 * 1024      # safe on v5e/v6e (128 MiB) and v7x (64 MiB)
_RESIDENT_PARAM_MAX_ROWS = 2048           # keep (R,1) mean/var resident below this


def _round_up(x, m):
    return (x + m - 1) // m * m


def _cdiv(a, b):
    return -(-a // b)


def _choose_tiles(R, L, itemsize, target_bytes=_TARGET_TILE_BYTES):
    """Pick (block_rows, block_lanes) for streaming an (R, L) array."""
    sub = max(8, 32 // itemsize)          # sublane multiple: 8 f32, 16 bf16, 32 int8
    L128 = _round_up(L, 128)              # lane-dense tiles
    R_sub = _round_up(R, sub)

    if sub * L128 * itemsize > target_bytes:
        # Even one sublane strip of the full lane extent blows the target:
        # tile the lane axis too (balanced blocks, multiples of 128).
        max_lanes = max(128, (target_bytes // (sub * itemsize)) // 128 * 128)
        n_lane_blocks = _cdiv(L128, max_lanes)
        block_lanes = _round_up(_cdiv(L128, n_lane_blocks), 128)
        block_rows = sub
    else:
        n_lane_blocks = 1
        block_lanes = L128
        block_rows = (target_bytes // (block_lanes * itemsize)) // sub * sub
        block_rows = max(sub, min(block_rows, R_sub))

    # v7x megacore: keep >= 2 grid steps when there are enough rows so both
    # TensorCores get work.
    if _cdiv(R_sub, block_rows) * n_lane_blocks < 2 and R_sub >= 2 * sub:
        block_rows = _round_up(_cdiv(R_sub, 2), sub)

    return block_rows, block_lanes


def _unnorm_kernel(x_ref, mean_ref, var_ref, o_ref, *, eps, block_rows,
                   resident_params):
    """out = x * sqrt(var + eps) + mean, per-row stats broadcast along lanes."""
    if resident_params:
        # mean_ref / var_ref hold the full (R_param, 1) arrays resident in
        # VMEM (constant index_map); slice out this tile's rows. R_param is a
        # multiple of block_rows, so the dynamic slice is always in bounds.
        r0 = pl.multiple_of(pl.program_id(0) * block_rows, block_rows)
        mean = mean_ref[pl.ds(r0, block_rows), :]
        var = var_ref[pl.ds(r0, block_rows), :]
    else:
        mean = mean_ref[...]
        var = var_ref[...]
    scale = jnp.sqrt(var.astype(jnp.float32) + eps)      # EUP; tiny per block
    x = x_ref[...].astype(jnp.float32)
    o_ref[...] = (x * scale + mean.astype(jnp.float32)).astype(o_ref.dtype)


def _unnorm_rows(x2d, mean_col, var_col, eps):
    """x2d: (R, L); mean_col/var_col: (R, 1) per-row stats. Returns (R, L)."""
    R, L = x2d.shape
    itemsize = x2d.dtype.itemsize

    block_rows, block_lanes = _choose_tiles(R, L, itemsize)
    grid = (_cdiv(R, block_rows), _cdiv(L, block_lanes))

    resident = R <= _RESIDENT_PARAM_MAX_ROWS
    if resident:
        # Only the tiny (R, 1) stat arrays get padded (to a block_rows
        # multiple) -- negligible cost, keeps in-kernel slices in bounds.
        rp = _round_up(R, block_rows)
        if rp != R:
            mean_col = jnp.pad(mean_col, ((0, rp - R), (0, 0)))
            var_col = jnp.pad(var_col, ((0, rp - R), (0, 0)))
        param_spec = pl.BlockSpec((rp, 1), lambda i, j: (0, 0))
    else:
        param_spec = pl.BlockSpec((block_rows, 1), lambda i, j: (i, 0))

    kernel = functools.partial(
        _unnorm_kernel, eps=float(eps), block_rows=block_rows,
        resident_params=resident)

    return pl.pallas_call(
        kernel,
        out_shape=jax.ShapeDtypeStruct((R, L), x2d.dtype),
        grid_spec=pltpu.PrefetchScalarGridSpec(
            num_scalar_prefetch=0,
            grid=grid,
            in_specs=[
                pl.BlockSpec((block_rows, block_lanes), lambda i, j: (i, j)),
                param_spec,
                param_spec,
            ],
            out_specs=pl.BlockSpec((block_rows, block_lanes), lambda i, j: (i, j)),
        ),
        compiler_params=pltpu.CompilerParams(
            dimension_semantics=("parallel", "parallel"),
            vmem_limit_bytes=_VMEM_LIMIT_BYTES,
        ),
    )(x2d, mean_col, var_col)


def instance_unnorm(x, mean, var, eps=1e-6):
    """JAX/Pallas equivalent of Instance_unnorm.forward (eps default matches module).

    4D: x (N, C, H, W); mean/var per-instance, e.g. (N, C, 1) or (N, C).
    2D: x (N, M);       mean/var per-row,      e.g. (N, 1) or (N,).
    """
    if x.ndim == 4:
        N, C, H, W = x.shape
        x2d = x.reshape(N * C, H * W)
        mean_col = jnp.reshape(mean, (N * C, -1))[:, :1]
        var_col = jnp.reshape(var, (N * C, -1))[:, :1]
        out = _unnorm_rows(x2d, mean_col, var_col, eps)
        return out.reshape(N, C, H, W)
    elif x.ndim == 2:
        N, M = x.shape
        mean_col = jnp.reshape(mean, (N, -1))[:, :1]
        var_col = jnp.reshape(var, (N, -1))[:, :1]
        return _unnorm_rows(x, mean_col, var_col, eps)
    else:
        raise ValueError("Instance_unnorm expects a 2D or 4D input.")


if __name__ == "__main__":
    key = jax.random.PRNGKey(0)
    k1, k2, k3, k4, k5 = jax.random.split(key, 5)
    eps = 1e-6

    # 4D, aligned shapes: N=2, C=4, H=W=16 ; per-(N, C) instance statistics.
    N, C, H, W = 2, 4, 16, 16
    x = jax.random.normal(k1, (N, C, H, W), dtype=jnp.float32)
    mean = jax.random.normal(k2, (N, C, 1), dtype=jnp.float32)
    var = jax.nn.softplus(jax.random.normal(k3, (N, C, 1), dtype=jnp.float32))
    out4 = jax.block_until_ready(instance_unnorm(x, mean, var, eps))
    ref4 = (x.reshape(N, C, -1) * jnp.sqrt(var + eps) + mean).reshape(N, C, H, W)
    assert jnp.allclose(out4, ref4, atol=1e-5, rtol=1e-5)

    # 4D, unaligned shapes (exercises partial edge tiles): N=1, C=3, H=W=7.
    x3 = jax.random.normal(k4, (1, 3, 7, 7), dtype=jnp.float32)
    mean3 = jnp.array([[0.1], [0.2], [-0.3]], dtype=jnp.float32)[None]
    var3 = jnp.array([[0.5], [1.5], [2.0]], dtype=jnp.float32)[None]
    out3 = jax.block_until_ready(instance_unnorm(x3, mean3, var3, eps))
    ref3 = (x3.reshape(1, 3, -1) * jnp.sqrt(var3 + eps) + mean3).reshape(1, 3, 7, 7)
    assert jnp.allclose(out3, ref3, atol=1e-5, rtol=1e-5)

    # 2D: N=8, M=128 ; per-row mean/var.
    N2, M = 8, 128
    x2 = jax.random.normal(k5, (N2, M), dtype=jnp.float32)
    mean2 = jnp.arange(N2, dtype=jnp.float32).reshape(N2, 1) * 0.1
    var2 = jnp.full((N2, 1), 0.5, dtype=jnp.float32)
    out2 = jax.block_until_ready(instance_unnorm(x2, mean2, var2, eps))
    ref2 = x2 * jnp.sqrt(var2 + eps) + mean2
    assert jnp.allclose(out2, ref2, atol=1e-5, rtol=1e-5)

    print("KERNEL_OK")
</pallas_src>

<mosaic_0001>
module attributes {stable_mosaic.version = 11 : i64} {
  func.func @_unnorm_kernel(%arg0: i32, %arg1: i32, %arg2: memref<8x256xf32, #tpu.memory_space<vmem>>, %arg3: memref<8x1xf32, #tpu.memory_space<vmem>>, %arg4: memref<8x1xf32, #tpu.memory_space<vmem>>, %arg5: memref<8x256xf32, #tpu.memory_space<vmem>>) attributes {dimension_semantics = [#tpu.dimension_semantics<parallel>, #tpu.dimension_semantics<parallel>], iteration_bounds = array<i64: 1, 1>, scalar_prefetch = 0 : i64, scratch_operands = 0 : i64, tpu.core_type = #tpu.core_type<tc>, window_params = [{transform_indices = @transform_0, window_bounds = array<i64: 8, 256>}, {pipeline_mode = #tpu.pipeline_mode<synchronous>, transform_indices = @transform_1, window_bounds = array<i64: 8, 1>}, {pipeline_mode = #tpu.pipeline_mode<synchronous>, transform_indices = @transform_2, window_bounds = array<i64: 8, 1>}, {transform_indices = @transform_3, window_bounds = array<i64: 8, 256>}]} {
    %c8_i32 = arith.constant 8 : i32
    %0 = arith.muli %arg0, %c8_i32 : i32
    %1 = tpu.assume_multiple %0, 8 : i32
    %2 = arith.index_cast %1 : i32 to index
    %c0 = arith.constant 0 : index
    %3 = vector.load %arg3[%2, %c0] : memref<8x1xf32, #tpu.memory_space<vmem>>, vector<8x1xf32>
    %4 = arith.index_cast %1 : i32 to index
    %c0_0 = arith.constant 0 : index
    %5 = vector.load %arg4[%4, %c0_0] : memref<8x1xf32, #tpu.memory_space<vmem>>, vector<8x1xf32>
    %cst = arith.constant 9.99999997E-7 : f32
    %6 = vector.broadcast %cst : f32 to vector<8x1xf32>
    %7 = arith.addf %5, %6 : vector<8x1xf32>
    %8 = math.sqrt %7 : vector<8x1xf32>
    %c0_1 = arith.constant 0 : index
    %c0_2 = arith.constant 0 : index
    %9 = vector.load %arg2[%c0_1, %c0_2] : memref<8x256xf32, #tpu.memory_space<vmem>>, vector<8x256xf32>
    %10 = vector.broadcast %8 : vector<8x1xf32> to vector<8x256xf32>
    %11 = arith.mulf %9, %10 : vector<8x256xf32>
    %12 = vector.broadcast %3 : vector<8x1xf32> to vector<8x256xf32>
    %13 = arith.addf %11, %12 : vector<8x256xf32>
    %c0_3 = arith.constant 0 : index
    %c0_4 = arith.constant 0 : index
    %14 = vector.load %arg5[%c0_3, %c0_4] : memref<8x256xf32, #tpu.memory_space<vmem>>, vector<8x256xf32>
    tpu.vector_store %arg5[%c0_3, %c0_4], %13 {strides = array<i32>} : memref<8x256xf32, #tpu.memory_space<vmem>>, vector<8x256xf32>,
    return
  }
  func.func @transform_0(%arg0: i32, %arg1: i32) -> (i32, i32) {
    %c0_i32 = arith.constant 0 : i32
    return %arg0, %arg1 : i32, i32
  }
  func.func @transform_1(%arg0: i32, %arg1: i32) -> (i32, i32) {
    %c0_i32 = arith.constant 0 : i32
    %c0_i32_0 = arith.constant 0 : i32
    %c0_i32_1 = arith.constant 0 : i32
    return %c0_i32, %c0_i32_0 : i32, i32
  }
  func.func @transform_2(%arg0: i32, %arg1: i32) -> (i32, i32) {
    %c0_i32 = arith.constant 0 : i32
    %c0_i32_0 = arith.constant 0 : i32
    %c0_i32_1 = arith.constant 0 : i32
    return %c0_i32, %c0_i32_0 : i32, i32
  }
  func.func @transform_3(%arg0: i32, %arg1: i32) -> (i32, i32) {
    %c0_i32 = arith.constant 0 : i32
    return %arg0, %arg1 : i32, i32
  }
}

</mosaic_0001>

<bundles_post_ra>
// kernel: tpu_custom_call.1
= control target key start
LH: loop header
LB: loop body
LE: loop exit
PB: predicated region body
PF: predicated region fallthrough
CT: control target
= control target key end

     0   :  { %v89_v1 = vmov 0   ;;  %s135_s0 = inlined_call_operand.vmem [shape: f32[8,256], index: 0, kind: input, shape index: {}]   ;;  %s136_s1 = inlined_call_operand.vmem [shape: f32[8,1], index: 1, kind: input, shape index: {}]   ;;  %s137_s2 = inlined_call_operand.vmem [shape: f32[8,1], index: 2, kind: input, shape index: {}]   ;;  %s138_s3 = inlined_call_operand.hbm [shape: f32[8,256], index: 3, kind: output, shape index: {}]  }
   0x1   :  { %v19_v0 = vld [vmem:[%s137_s2] sm:$0xff]  ;;  %62 = vset.pattern.permute.xlu0 %v89_v1 }
   0x2   :  { %v20_v2 = vadd.f32 1e-06, %v19_v0 }
   0x3   :  { %8 = vsyncpa [#allocation3], 0  ;;  %v17_v8 = vld [vmem:[%s136_s1] sm:$0xff]  ;;  %v29_v10 = vld [vmem:[%s135_s0 + $0x8] sm:$0xff]  ;;  %s90_s19 = smov [#allocation2]  }
   0x4   :  { %63 = vrsqrt.f32 %v20_v2  ;;  %vm23_vm0 = vcmp.eq.f32.partialorder %v20_v2, inf  ;;  %v26_v4 = vand.u32 2147483648, %v20_v2  ;;  %vm25_vm1 = vcmp.eq.f32.partialorder %v20_v2, 0.0  ;;  %v28_v9 = vld [vmem:[%s135_s0] sm:$0xff]  ;;  %s52_s20 = sshll.u32 %s90_s19, 4  ;;  %s53_s20 = int_to_ptr.vmem [resolvable:$true] %s52_s20 }
   0x5   :  { %s65_s1 = scalar_lea.vmem %s53_s20, 256  ;;  %p70_p1 = scmp.lt.s32.totalorder %s53_s20, %s53_s20 }
   0x6   :  { %p66_p0 = scmp.ne.s32.totalorder %s53_s20, %s65_s1  ;;  %p71_p2 = scmp.lt.s32.totalorder %s65_s1, %s65_s1 }
   0x8   :  { %p72_p3 = por %p71_p2, %p70_p1 }
   0xa   :  { %p73_p4 = pnand %p72_p3, %p66_p0 }
   0xe   :  { %v64_v3 = vpop.eup %63 }
   0xf   :  { %v22_v5 = vmul.f32 %v64_v3, %v20_v2 }
  0x11   :  { %v24_v6 = vsel %vm23_vm0, %v20_v2, %v22_v5 }
  0x12   :  { %v27_v7 = vsel %vm25_vm1, %v26_v4, %v24_v6 }
  0x13   :  { %32 = vperm.xlu0 %62, %v27_v7  }
  0x17   :  { %39 = vperm.xlu0 %62, %v17_v8  }
  0x92   :  { %v33_v11 = vpop.permute.xlu0 %32 }
  0x93   :  { %v35_v12 = vmul.f32 %v33_v11, %v28_v9  ;;  %v36_v13 = vmul.f32 %v33_v11, %v29_v10 }
  0x96   :  { %v40_v14 = vpop.permute.xlu0 %39 }
  0x97   :  { %v42_v15 = vadd.f32 %v40_v14, %v35_v12  ;;  %v43_v16 = vadd.f32 %v40_v14, %v36_v13 }
  0x99   :  { %44 = vst [vmem:[#allocation2] sm:$0xff] %v42_v15  ;;  %45 = vst [vmem:[#allocation2 + $0x8] sm:$0xff] %v43_v16 }
  0x9a   :  { %76 = shalt.err (!%p73_p4)
}
  0x9b   :  { %s77_s22 = scalar_lea.hbm %s138_s3, 256 }
  0x9c   :  { %p78_p5 = scmp.ne.s32.totalorder %s138_s3, %s77_s22  ;;  %p81_p6 = scmp.lt.u32.totalorder %s77_s22, %s138_s3 }
  0x9e   :  { %p83_p7 = pnand %p81_p6, %p78_p5 }
  0xa0   :  { %86 = shalt.err (!%p83_p7)
}
  0xa1   :  { %55 = dma.vmem_to_hbm [thread:$0]  %s53_s20, 256, %s138_s3, [#allocation3]  }
  0xa2   :  { %87 = dma.done.wait [#allocation3], 256  }
  0xa3   :  { %88 = vsyncadd [#allocation3], 4294967040 }
  0xa4   :  { %59 = vsyncpa [#allocation3], 1 }

</bundles_post_ra>
